<compile_context>
chip_gen: v6e
topology: v6e:2x2x1
jax: 0.10.0
libtpu: 0.0.40
codegen_flags: <defaults>
</compile_context>

<pallas_src>
import functools

import jax
import jax.numpy as jnp
from jax.experimental import pallas as pl
from jax.experimental.pallas import tpu as pltpu

_LN_EPS = 1e-5
_HIDDEN = 50          # true fc2 / LayerNorm width
_HIDDEN_PAD = 128     # lane-padded hidden width (internal compute width)
_MAX_TB = 2048        # batch-tile cap: few MiB of VMEM per step on v5e/v6e/v7x


def _round_up(n, m):
    return ((n + m - 1) // m) * m


def _mlp_kernel(x_ref, w2_ref, b2_ref, g2_ref, beta2_ref, w3_ref, b3_ref,
                o_ref, *, hidden_true, num_classes):
    """Fused fc2 -> LayerNorm(50) -> GELU -> fc3 over one [TB, feats] batch tile."""
    x = x_ref[...]                                                    # [TB, F] f32

    # fc2 (hidden zero-padded to 128 lanes -> padded lanes of h are exactly 0)
    h = jnp.dot(x, w2_ref[...], preferred_element_type=jnp.float32) + b2_ref[...]

    # One-pass LayerNorm stats over the TRUE hidden width; full-lane sums equal
    # true sums because the padded lanes are identically zero.
    inv_n = jnp.float32(1.0 / hidden_true)
    mean = jnp.sum(h, axis=-1, keepdims=True) * inv_n
    ex2 = jnp.sum(h * h, axis=-1, keepdims=True) * inv_n
    var = jnp.maximum(ex2 - mean * mean, 0.0)   # guard against FP cancellation
    hn = (h - mean) * jax.lax.rsqrt(var + _LN_EPS)
    # gamma/beta are zero-padded, so padded lanes collapse back to exactly 0.
    hn = hn * g2_ref[...] + beta2_ref[...]

    # Exact-erf GELU (PyTorch nn.GELU default).  GELU(0) == 0 keeps pads zero.
    g = 0.5 * hn * (1.0 + jax.lax.erf(hn * 0.7071067811865476))

    # fc3 at lane-padded width on the MXU, then store ONLY the live logits:
    # the output block covers the full (true) class dim, so the writeback DMA
    # is contiguous while HBM output bytes drop ~12x vs a 128-lane f32 slab.
    y = jnp.dot(g, w3_ref[...], preferred_element_type=jnp.float32) + b3_ref[...]
    o_ref[...] = y[:, :num_classes].astype(o_ref.dtype)


def neural_net_forward(x, padded_params, num_classes):
    """x: [B, feats] float32.  padded_params: see pad_params_for_kernel."""
    B, feats = x.shape
    cp = padded_params["w3"].shape[1]          # lane-padded class dim (mult of 128)

    # Tile selection:
    #  * balance tiles so tail waste is < 8 rows per tile (no fixed-512 padding),
    #  * guarantee >= 2 grid steps when B > 8 so both v7x TensorCores get a tile,
    #  * cap TB at 2048 so per-step VMEM stays a few MiB on every generation
    #    (well under the 16 MiB default scoped limit on v5e).
    n_tiles = pl.cdiv(B, _MAX_TB)
    if B > 8:
        n_tiles = max(n_tiles, 2)
    TB = min(_MAX_TB, _round_up(pl.cdiv(B, n_tiles), 8))
    B_pad = _round_up(B, TB)
    if B_pad != B:
        x = jnp.pad(x, ((0, B_pad - B), (0, 0)))
    n_steps = B_pad // TB

    weight_bytes = sum(int(v.size) * v.dtype.itemsize for v in padded_params.values())
    cost = pl.CostEstimate(
        flops=2 * B_pad * (feats * _HIDDEN_PAD + _HIDDEN_PAD * cp),
        transcendentals=2 * B_pad * _HIDDEN_PAD,           # rsqrt + erf per element
        bytes_accessed=4 * B_pad * (feats + num_classes) + weight_bytes,
    )

    out = pl.pallas_call(
        functools.partial(_mlp_kernel, hidden_true=_HIDDEN, num_classes=num_classes),
        out_shape=jax.ShapeDtypeStruct((B_pad, num_classes), jnp.float32),
        grid=(n_steps,),
        in_specs=[
            # batch-tiled input
            pl.BlockSpec((TB, feats), lambda i: (i, 0)),
            # weights / biases: constant block index -> VMEM-resident across grid
            pl.BlockSpec((feats, _HIDDEN_PAD), lambda i: (0, 0)),
            pl.BlockSpec((1, _HIDDEN_PAD), lambda i: (0, 0)),
            pl.BlockSpec((1, _HIDDEN_PAD), lambda i: (0, 0)),
            pl.BlockSpec((1, _HIDDEN_PAD), lambda i: (0, 0)),
            pl.BlockSpec((_HIDDEN_PAD, cp), lambda i: (0, 0)),
            pl.BlockSpec((1, cp), lambda i: (0, 0)),
        ],
        # true-width output: no padded slab, no wrapper column slice
        out_specs=pl.BlockSpec((TB, num_classes), lambda i: (i, 0)),
        compiler_params=pltpu.CompilerParams(
            dimension_semantics=("parallel",),   # shard batch tiles across TCs (v7x)
        ),
        cost_estimate=cost,
    )(
        x,
        padded_params["w2"], padded_params["b2"],
        padded_params["ln2_gamma"], padded_params["ln2_beta"],
        padded_params["w3"], padded_params["b3"],
    )
    return out[:B] if B_pad != B else out


def init_params(key, feats, num_classes):
    """Natural-shape params (match the live branch of the torch module).

    Weights are stored [in_features, out_features] (transposed vs nn.Linear)
    so the kernel does plain x @ W + b on the MXU.
    """
    k = jax.random.split(key, 6)
    h = _HIDDEN
    w2 = jax.random.normal(k[0], (feats, h), jnp.float32) * (1.0 / jnp.sqrt(feats))
    b2 = jax.random.normal(k[1], (1, h), jnp.float32) * 0.01
    ln2_gamma = 1.0 + 0.1 * jax.random.normal(k[2], (1, h), jnp.float32)
    ln2_beta = 0.1 * jax.random.normal(k[3], (1, h), jnp.float32)
    w3 = jax.random.normal(k[4], (h, num_classes), jnp.float32) * (1.0 / jnp.sqrt(h))
    b3 = jax.random.normal(k[5], (1, num_classes), jnp.float32) * 0.01
    return {"w2": w2, "b2": b2, "ln2_gamma": ln2_gamma, "ln2_beta": ln2_beta,
            "w3": w3, "b3": b3}


def pad_params_for_kernel(params):
    """Zero-pad hidden (50->128) and classes (->mult of 128) for lane density.

    Contract: all padded entries MUST be exactly zero so that (a) padded lanes
    of h are zero and the /50 LayerNorm stats are exact, and (b) padded lanes
    collapse back to zero through gamma/beta and GELU.  jnp.pad guarantees it.
    """
    nc = params["w3"].shape[1]
    cp = _round_up(nc, 128)

    def pad2(a, rows, cols):
        return jnp.pad(a, ((0, rows - a.shape[0]), (0, cols - a.shape[1])))

    return {
        "w2": pad2(params["w2"], params["w2"].shape[0], _HIDDEN_PAD),
        "b2": pad2(params["b2"], 1, _HIDDEN_PAD),
        "ln2_gamma": pad2(params["ln2_gamma"], 1, _HIDDEN_PAD),
        "ln2_beta": pad2(params["ln2_beta"], 1, _HIDDEN_PAD),
        "w3": pad2(params["w3"], _HIDDEN_PAD, cp),
        "b3": pad2(params["b3"], 1, cp),
    }


def _reference_forward(x, p):
    """Plain-JAX reference (natural shapes, two-pass LayerNorm, exact-erf GELU)."""
    h = x @ p["w2"] + p["b2"]
    mean = jnp.mean(h, axis=-1, keepdims=True)
    var = jnp.mean((h - mean) ** 2, axis=-1, keepdims=True)
    h = (h - mean) * jax.lax.rsqrt(var + _LN_EPS)
    h = h * p["ln2_gamma"] + p["ln2_beta"]
    g = 0.5 * h * (1.0 + jax.lax.erf(h / jnp.sqrt(2.0)))
    return g @ p["w3"] + p["b3"]


if __name__ == "__main__":
    feats = 32
    num_classes = 10
    batch = 8

    key = jax.random.PRNGKey(0)
    kx, kp = jax.random.split(key)
    x = jax.random.normal(kx, (batch, feats), jnp.float32)

    params = init_params(kp, feats, num_classes)
    padded = pad_params_for_kernel(params)

    # Assert the zero-padding contract the kernel relies on.
    assert float(jnp.abs(padded["w2"][:, _HIDDEN:]).max()) == 0.0
    assert float(jnp.abs(padded["b2"][:, _HIDDEN:]).max()) == 0.0
    assert float(jnp.abs(padded["ln2_gamma"][:, _HIDDEN:]).max()) == 0.0
    assert float(jnp.abs(padded["ln2_beta"][:, _HIDDEN:]).max()) == 0.0
    assert float(jnp.abs(padded["w3"][_HIDDEN:, :]).max()) == 0.0

    out = neural_net_forward(x, padded, num_classes)
    out = jax.block_until_ready(out)

    ref = _reference_forward(x, params)
    assert out.shape == (batch, num_classes)
    assert jnp.allclose(out, ref, atol=1e-4, rtol=1e-4), float(jnp.max(jnp.abs(out - ref)))

    print("KERNEL_OK")
</pallas_src>

<mosaic_0001>
module attributes {stable_mosaic.version = 11 : i64} {
  func.func @_mlp_kernel(%arg0: i32, %arg1: memref<8x32xf32, #tpu.memory_space<vmem>>, %arg2: memref<32x128xf32, #tpu.memory_space<vmem>>, %arg3: memref<1x128xf32, #tpu.memory_space<vmem>>, %arg4: memref<1x128xf32, #tpu.memory_space<vmem>>, %arg5: memref<1x128xf32, #tpu.memory_space<vmem>>, %arg6: memref<128x128xf32, #tpu.memory_space<vmem>>, %arg7: memref<1x128xf32, #tpu.memory_space<vmem>>, %arg8: memref<8x10xf32, #tpu.memory_space<vmem>>) attributes {dimension_semantics = [#tpu.dimension_semantics<parallel>], iteration_bounds = array<i64: 1>, scalar_prefetch = 0 : i64, scratch_operands = 0 : i64, tpu.core_type = #tpu.core_type<tc>, window_params = [{transform_indices = @transform_0, window_bounds = array<i64: 8, 32>}, {pipeline_mode = #tpu.pipeline_mode<synchronous>, transform_indices = @transform_1, window_bounds = array<i64: 32, 128>}, {pipeline_mode = #tpu.pipeline_mode<synchronous>, transform_indices = @transform_2, window_bounds = array<i64: 1, 128>}, {pipeline_mode = #tpu.pipeline_mode<synchronous>, transform_indices = @transform_3, window_bounds = array<i64: 1, 128>}, {pipeline_mode = #tpu.pipeline_mode<synchronous>, transform_indices = @transform_4, window_bounds = array<i64: 1, 128>}, {pipeline_mode = #tpu.pipeline_mode<synchronous>, transform_indices = @transform_5, window_bounds = array<i64: 128, 128>}, {pipeline_mode = #tpu.pipeline_mode<synchronous>, transform_indices = @transform_6, window_bounds = array<i64: 1, 128>}, {transform_indices = @transform_7, window_bounds = array<i64: 8, 10>}]} {
    %c0 = arith.constant 0 : index
    %c0_0 = arith.constant 0 : index
    %0 = vector.load %arg1[%c0, %c0_0] : memref<8x32xf32, #tpu.memory_space<vmem>>, vector<8x32xf32>
    %c0_1 = arith.constant 0 : index
    %c0_2 = arith.constant 0 : index
    %1 = vector.load %arg2[%c0_1, %c0_2] : memref<32x128xf32, #tpu.memory_space<vmem>>, vector<32x128xf32>
    %cst = arith.constant dense<0.000000e+00> : vector<8x128xf32>
    %2 = tpu.matmul %0, %1, %cst {dimension_numbers = #tpu.dot_dimension_numbers<[1], [0], [0], [1], [0, 0, 1, 1], [], []>} : vector<8x32xf32>, vector<32x128xf32>, vector<8x128xf32> -> vector<8x128xf32>
    %c0_3 = arith.constant 0 : index
    %c0_4 = arith.constant 0 : index
    %3 = vector.load %arg3[%c0_3, %c0_4] : memref<1x128xf32, #tpu.memory_space<vmem>>, vector<1x128xf32>
    %4 = vector.broadcast %3 : vector<1x128xf32> to vector<8x128xf32>
    %5 = arith.addf %2, %4 : vector<8x128xf32>
    %cst_5 = arith.constant dense<0.000000e+00> : vector<8xf32>
    %6 = vector.multi_reduction <add>, %5, %cst_5 [1] : vector<8x128xf32> to vector<8xf32>
    %7 = vector.shape_cast %6 : vector<8xf32> to vector<8x1xf32>
    %cst_6 = arith.constant 2.000000e-02 : f32
    %8 = vector.broadcast %cst_6 : f32 to vector<8x1xf32>
    %9 = arith.mulf %7, %8 : vector<8x1xf32>
    %10 = arith.mulf %5, %5 : vector<8x128xf32>
    %cst_7 = arith.constant dense<0.000000e+00> : vector<8xf32>
    %11 = vector.multi_reduction <add>, %10, %cst_7 [1] : vector<8x128xf32> to vector<8xf32>
    %12 = vector.shape_cast %11 : vector<8xf32> to vector<8x1xf32>
    %cst_8 = arith.constant 2.000000e-02 : f32
    %13 = vector.broadcast %cst_8 : f32 to vector<8x1xf32>
    %14 = arith.mulf %12, %13 : vector<8x1xf32>
    %15 = arith.mulf %9, %9 : vector<8x1xf32>
    %16 = arith.subf %14, %15 : vector<8x1xf32>
    %cst_9 = arith.constant 0.000000e+00 : f32
    %17 = vector.broadcast %cst_9 : f32 to vector<8x1xf32>
    %18 = arith.maximumf %16, %17 : vector<8x1xf32>
    %19 = vector.broadcast %9 : vector<8x1xf32> to vector<8x128xf32>
    %20 = arith.subf %5, %19 : vector<8x128xf32>
    %cst_10 = arith.constant 9.99999974E-6 : f32
    %21 = vector.broadcast %cst_10 : f32 to vector<8x1xf32>
    %22 = arith.addf %18, %21 : vector<8x1xf32>
    %23 = math.rsqrt %22 : vector<8x1xf32>
    %24 = vector.broadcast %23 : vector<8x1xf32> to vector<8x128xf32>
    %25 = arith.mulf %20, %24 : vector<8x128xf32>
    %c0_11 = arith.constant 0 : index
    %c0_12 = arith.constant 0 : index
    %26 = vector.load %arg4[%c0_11, %c0_12] : memref<1x128xf32, #tpu.memory_space<vmem>>, vector<1x128xf32>
    %27 = vector.broadcast %26 : vector<1x128xf32> to vector<8x128xf32>
    %28 = arith.mulf %25, %27 : vector<8x128xf32>
    %c0_13 = arith.constant 0 : index
    %c0_14 = arith.constant 0 : index
    %29 = vector.load %arg5[%c0_13, %c0_14] : memref<1x128xf32, #tpu.memory_space<vmem>>, vector<1x128xf32>
    %30 = vector.broadcast %29 : vector<1x128xf32> to vector<8x128xf32>
    %31 = arith.addf %28, %30 : vector<8x128xf32>
    %cst_15 = arith.constant 5.000000e-01 : f32
    %32 = vector.broadcast %cst_15 : f32 to vector<8x128xf32>
    %33 = arith.mulf %32, %31 : vector<8x128xf32>
    %cst_16 = arith.constant 0.707106769 : f32
    %34 = vector.broadcast %cst_16 : f32 to vector<8x128xf32>
    %35 = arith.mulf %31, %34 : vector<8x128xf32>
    %36 = math.erf %35 : vector<8x128xf32>
    %cst_17 = arith.constant 1.000000e+00 : f32
    %37 = vector.broadcast %cst_17 : f32 to vector<8x128xf32>
    %38 = arith.addf %37, %36 : vector<8x128xf32>
    %39 = arith.mulf %33, %38 : vector<8x128xf32>
    %c0_18 = arith.constant 0 : index
    %c0_19 = arith.constant 0 : index
    %40 = vector.load %arg6[%c0_18, %c0_19] : memref<128x128xf32, #tpu.memory_space<vmem>>, vector<128x128xf32>
    %cst_20 = arith.constant dense<0.000000e+00> : vector<8x128xf32>
    %41 = tpu.matmul %39, %40, %cst_20 {dimension_numbers = #tpu.dot_dimension_numbers<[1], [0], [0], [1], [0, 0, 1, 1], [], []>} : vector<8x128xf32>, vector<128x128xf32>, vector<8x128xf32> -> vector<8x128xf32>
    %c0_21 = arith.constant 0 : index
    %c0_22 = arith.constant 0 : index
    %42 = vector.load %arg7[%c0_21, %c0_22] : memref<1x128xf32, #tpu.memory_space<vmem>>, vector<1x128xf32>
    %43 = vector.broadcast %42 : vector<1x128xf32> to vector<8x128xf32>
    %44 = arith.addf %41, %43 : vector<8x128xf32>
    %45 = vector.extract_strided_slice %44 {offsets = [0, 0], sizes = [8, 10], strides = [1, 1]} : vector<8x128xf32> to vector<8x10xf32>
    %c0_23 = arith.constant 0 : index
    %c0_24 = arith.constant 0 : index
    %46 = vector.load %arg8[%c0_23, %c0_24] : memref<8x10xf32, #tpu.memory_space<vmem>>, vector<8x10xf32>
    tpu.vector_store %arg8[%c0_23, %c0_24], %45 {strides = array<i32>} : memref<8x10xf32, #tpu.memory_space<vmem>>, vector<8x10xf32>,
    return
  }
  func.func @transform_0(%arg0: i32) -> (i32, i32) {
    %c0_i32 = arith.constant 0 : i32
    %c0_i32_0 = arith.constant 0 : i32
    return %arg0, %c0_i32 : i32, i32
  }
  func.func @transform_1(%arg0: i32) -> (i32, i32) {
    %c0_i32 = arith.constant 0 : i32
    %c0_i32_0 = arith.constant 0 : i32
    %c0_i32_1 = arith.constant 0 : i32
    return %c0_i32, %c0_i32_0 : i32, i32
  }
  func.func @transform_2(%arg0: i32) -> (i32, i32) {
    %c0_i32 = arith.constant 0 : i32
    %c0_i32_0 = arith.constant 0 : i32
    %c0_i32_1 = arith.constant 0 : i32
    return %c0_i32, %c0_i32_0 : i32, i32
  }
  func.func @transform_3(%arg0: i32) -> (i32, i32) {
    %c0_i32 = arith.constant 0 : i32
    %c0_i32_0 = arith.constant 0 : i32
    %c0_i32_1 = arith.constant 0 : i32
    return %c0_i32, %c0_i32_0 : i32, i32
  }
  func.func @transform_4(%arg0: i32) -> (i32, i32) {
    %c0_i32 = arith.constant 0 : i32
    %c0_i32_0 = arith.constant 0 : i32
    %c0_i32_1 = arith.constant 0 : i32
    return %c0_i32, %c0_i32_0 : i32, i32
  }
  func.func @transform_5(%arg0: i32) -> (i32, i32) {
    %c0_i32 = arith.constant 0 : i32
    %c0_i32_0 = arith.constant 0 : i32
    %c0_i32_1 = arith.constant 0 : i32
    return %c0_i32, %c0_i32_0 : i32, i32
  }
  func.func @transform_6(%arg0: i32) -> (i32, i32) {
    %c0_i32 = arith.constant 0 : i32
    %c0_i32_0 = arith.constant 0 : i32
    %c0_i32_1 = arith.constant 0 : i32
    return %c0_i32, %c0_i32_0 : i32, i32
  }
  func.func @transform_7(%arg0: i32) -> (i32, i32) {
    %c0_i32 = arith.constant 0 : i32
    %c0_i32_0 = arith.constant 0 : i32
    return %arg0, %c0_i32 : i32, i32
  }
}

</mosaic_0001>

<bundles_post_ra>
// kernel: tpu_custom_call.1
= control target key start
LH: loop header
LB: loop body
LE: loop exit
PB: predicated region body
PF: predicated region fallthrough
CT: control target
= control target key end

     0   :  { %12 = vsyncpa [#allocation3], 0  ;;  %s569_s0 = inlined_call_operand.hbm [shape: f32[8,32], index: 0, kind: input, shape index: {}]   ;;  %s570_s1 = inlined_call_operand.hbm [shape: f32[32,128], index: 1, kind: input, shape index: {}]   ;;  %s571_s2 = inlined_call_operand.vmem [shape: f32[1,128], index: 2, kind: input, shape index: {}]   ;;  %s572_s3 = inlined_call_operand.vmem [shape: f32[1,128], index: 3, kind: input, shape index: {}]   ;;  %s573_s4 = inlined_call_operand.vmem [shape: f32[1,128], index: 4, kind: input, shape index: {}]   ;;  %s574_s5 = inlined_call_operand.hbm [shape: f32[128,128], index: 5, kind: input, shape index: {}]   ;;  %s575_s6 = inlined_call_operand.vmem [shape: f32[1,128], index: 6, kind: input, shape index: {}]   ;;  %s576_s7 = inlined_call_operand.hbm [shape: f32[8,10], index: 7, kind: output, shape index: {}]  }
   0x1   :  { %13 = vsyncpa [#allocation6], 0 }
   0x2   :  { %14 = vsyncpa [#allocation4], 0  ;;  %s469_s24 = smov [#allocation5]  }
   0x3   :  { %s30_s25 = sshll.u32 %s469_s24, 4  ;;  %s31_s25 = int_to_ptr.vmem [resolvable:$true] %s30_s25 }
   0x4   :  { %s391_s26 = scalar_lea.vmem %s31_s25, 512  ;;  %p396_p1 = scmp.lt.s32.totalorder %s31_s25, %s31_s25 }
   0x5   :  { %p392_p0 = scmp.ne.s32.totalorder %s31_s25, %s391_s26  ;;  %p397_p2 = scmp.lt.s32.totalorder %s391_s26, %s391_s26 }
   0x7   :  { %p398_p3 = por %p397_p2, %p396_p1 }
   0x9   :  { %p399_p4 = pnand %p398_p3, %p392_p0 }
   0xb   :  { %402 = shalt.err (!%p399_p4)
}
   0xc   :  { %s470_s27 = smov 128   ;;  %s471_s28 = smov 8  }
   0xd   :  { %36 = dma.hbm_to_vmem [thread:$0]  %s570_s1, 512, %s31_s25, [#allocation6], %s470_s27, %s470_s27, %s471_s28  }
   0xe   :  { %s472_s8 = smov [#allocation2]   ;;  %s473_s10 = smov [#allocation7]  }
   0xf   :  { %s21_s9 = sshll.u32 %s472_s8, 4  ;;  %s48_s11 = sshll.u32 %s473_s10, 4  ;;  %s22_s9 = int_to_ptr.vmem [resolvable:$true] %s21_s9  ;;  %s49_s11 = int_to_ptr.vmem [resolvable:$true] %s48_s11 }
  0x10   :  { %s411_s12 = scalar_lea.vmem %s22_s9, 128  ;;  %p416_p6 = scmp.lt.s32.totalorder %s22_s9, %s22_s9 }
  0x11   :  { %p412_p5 = scmp.ne.s32.totalorder %s22_s9, %s411_s12  ;;  %p417_p7 = scmp.lt.s32.totalorder %s411_s12, %s411_s12 }
  0x13   :  { %p418_p8 = por %p417_p7, %p416_p6 }
  0x15   :  { %p419_p9 = pnand %p418_p8, %p412_p5 }
  0x17   :  { %422 = shalt.err (!%p419_p9)
}
  0x18   :  { %24 = dma.hbm_to_vmem [thread:$0]  %s569_s0, 128, %s22_s9, [#allocation3]  }
  0x19   :  { %s431_s15 = scalar_lea.vmem %s49_s11, 2048  ;;  %p436_p11 = scmp.lt.s32.totalorder %s49_s11, %s49_s11 }
  0x1a   :  { %p432_p10 = scmp.ne.s32.totalorder %s49_s11, %s431_s15  ;;  %p437_p12 = scmp.lt.s32.totalorder %s431_s15, %s431_s15 }
  0x1c   :  { %p438_p13 = por %p437_p12, %p436_p11 }
  0x1e   :  { %p439_p0 = pnand %p438_p13, %p432_p10 }
  0x20   :  { %442 = shalt.err (!%p439_p0)
}
  0x21   :  { %54 = dma.hbm_to_vmem [thread:$0]  %s574_s5, 2048, %s49_s11, [#allocation6], %s470_s27, %s470_s27, %s471_s28  }
  0x22   :  { %463 = dma.done.wait [#allocation3], 128  }
  0x23   :  { %464 = vsyncadd [#allocation3], 4294967168 }
  0x24   :  { %465 = dma.done.wait [#allocation6], 2560  }
  0x25   :  { %466 = vsyncadd [#allocation6], 4294964736  ;;  %v474_v0 = vmov 0.0   ;;  %vm475_vm0 = vmmov 0   ;;  %v70_v1 = vld [vmem:[#allocation5 + $0x18] sm:$0xff]  ;;  %v69_v2 = vld [vmem:[#allocation5 + $0x10] sm:$0xff] }
  0x26   :  { %325 = vmatprep.subr.mxu0 %v474_v0  ;;  %333 = vmatprep.mubr.msk.f32.mxu0 %vm475_vm0, %v474_v0  ;;  %v68_v3 = vld [vmem:[#allocation5 + $0x8] sm:$0xff]  ;;  %v67_v4 = vld [vmem:[#allocation5] sm:$0xff]  ;;  %v66_v5 = vld [vmem:[#allocation2] sm:$0xff]  ;;  %vm78_vm1 = vcmask 261120   ;;  %s476_s22 = smov [#allocation8]   ;;  %vm280_vm2 = vcmask 80896  }
  0x27   :  { %336 = vmatprep.subr.mxu1 %v474_v0  ;;  %368 = vmatprep.mubr.msk.f32.mxu1 %vm475_vm0, %v474_v0  ;;  %v298_v6 = vld [vmem:[%s571_s2] ss:$0 sm:$0xff]  ;;  %v201_v12 = vld [vmem:[#allocation7 + $0x70] sm:$0xff]  ;;  %v200_v13 = vld [vmem:[#allocation7 + $0x68] sm:$0xff] }
  0x28   :  { %326 = vmatpush3.msra.mxu0 %v70_v1  ;;  %v202_v11 = vld [vmem:[#allocation7 + $0x78] sm:$0xff]  ;;  %v199_v14 = vld [vmem:[#allocation7 + $0x60] sm:$0xff]  ;;  %v197_v16 = vld [vmem:[#allocation7 + $0x50] sm:$0xff] }
  0x29   :  { %327 = vmatprep.subr.mxu0 %v474_v0  ;;  %337 = vmatpush3.msra.mxu1 %v202_v11  ;;  %v198_v15 = vld [vmem:[#allocation7 + $0x58] sm:$0xff]  ;;  %v196_v17 = vld [vmem:[#allocation7 + $0x48] sm:$0xff]  ;;  %v195_v18 = vld [vmem:[#allocation7 + $0x40] sm:$0xff] }
  0x2a   :  { %328 = vmatpush3.msra.mxu0 %v69_v2  ;;  %338 = vmatprep.subr.mxu1 %v474_v0  ;;  %v194_v19 = vld [vmem:[#allocation7 + $0x38] sm:$0xff]  ;;  %v193_v20 = vld [vmem:[#allocation7 + $0x30] sm:$0xff]  ;;  %v192_v21 = vld [vmem:[#allocation7 + $0x28] sm:$0xff] }
  0x2b   :  { %329 = vmatprep.subr.mxu0 %v474_v0  ;;  %339 = vmatpush3.msra.mxu1 %v201_v12  ;;  %v191_v22 = vld [vmem:[#allocation7 + $0x20] sm:$0xff]  ;;  %v190_v23 = vld [vmem:[#allocation7 + $0x18] sm:$0xff]  ;;  %v189_v24 = vld [vmem:[#allocation7 + $0x10] sm:$0xff] }
  0x2c   :  { %330 = vmatpush3.msra.mxu0 %v68_v3  ;;  %340 = vmatprep.subr.mxu1 %v474_v0  ;;  %v188_v25 = vld [vmem:[#allocation7 + $0x8] sm:$0xff]  ;;  %v187_v26 = vld [vmem:[#allocation7] sm:$0xff]  ;;  %v300_v37 = vld [vmem:[%s572_s3] ss:$0 sm:$0xff]  ;;  %s288_s3 = sshll.u32 %s476_s22, 4  ;;  %s289_s3 = int_to_ptr.vmem [resolvable:$true] %s288_s3 }
  0x2d   :  { %331 = vmatprep.subr.mxu0 %v474_v0  ;;  %341 = vmatpush3.msra.mxu1 %v200_v13  ;;  %v301_v39 = vld [vmem:[%s573_s4] ss:$0 sm:$0xff]  ;;  %s443_s4 = scalar_lea.vmem %s289_s3, 128  ;;  %p448_p2 = scmp.lt.s32.totalorder %s289_s3, %s289_s3 }
  0x2e   :  { %332 = vmatpush3.msra.mxu0 %v67_v4  ;;  %342 = vmatprep.subr.mxu1 %v474_v0  ;;  %v302_v47 = vld [vmem:[%s575_s6] ss:$0 sm:$0xff]  ;;  %p444_p1 = scmp.ne.s32.totalorder %s289_s3, %s443_s4  ;;  %p449_p3 = scmp.lt.s32.totalorder %s443_s4, %s443_s4 }
  0x2f   :  { %334 = vmatmul.mubr.msk.f32.vlgmr.msra.gmra.mxu0 %vm78_vm1, %v66_v5  ;;  %343 = vmatpush3.msra.mxu1 %v199_v14 }
  0x30   :  { %344 = vmatprep.subr.mxu1 %v474_v0  ;;  %p450_p4 = por %p449_p3, %p448_p2 }
  0x31   :  { %345 = vmatpush3.msra.mxu1 %v198_v15 }
  0x32   :  { %346 = vmatprep.subr.mxu1 %v474_v0  ;;  %p451_p5 = pnand %p450_p4, %p444_p1 }
  0x33   :  { %347 = vmatpush3.msra.mxu1 %v197_v16 }
  0x34   :  { %348 = vmatprep.subr.mxu1 %v474_v0 }
  0x35   :  { %349 = vmatpush3.msra.mxu1 %v196_v17 }
  0x36   :  { %350 = vmatprep.subr.mxu1 %v474_v0 }
  0x37   :  { %351 = vmatpush3.msra.mxu1 %v195_v18 }
  0x38   :  { %352 = vmatprep.subr.mxu1 %v474_v0 }
  0x39   :  { %353 = vmatpush3.msra.mxu1 %v194_v19 }
  0x3a   :  { %354 = vmatprep.subr.mxu1 %v474_v0 }
  0x3b   :  { %355 = vmatpush3.msra.mxu1 %v193_v20 }
  0x3c   :  { %356 = vmatprep.subr.mxu1 %v474_v0 }
  0x3d   :  { %357 = vmatpush3.msra.mxu1 %v192_v21 }
  0x3e   :  { %358 = vmatprep.subr.mxu1 %v474_v0 }
  0x3f   :  { %359 = vmatpush3.msra.mxu1 %v191_v22 }
  0x40   :  { %360 = vmatprep.subr.mxu1 %v474_v0 }
  0x41   :  { %361 = vmatpush3.msra.mxu1 %v190_v23 }
  0x42   :  { %362 = vmatprep.subr.mxu1 %v474_v0 }
  0x43   :  { %363 = vmatpush3.msra.mxu1 %v189_v24 }
  0x44   :  { %364 = vmatprep.subr.mxu1 %v474_v0 }
  0x45   :  { %365 = vmatpush3.msra.mxu1 %v188_v25 }
  0x46   :  { %366 = vmatprep.subr.mxu1 %v474_v0 }
  0x47   :  { %367 = vmatpush3.msra.mxu1 %v187_v26 }
  0xef   :  { %v148_v7 = vpop.f32.mrf.mxu0 }
  0xf0   :  { %v536_v8 = vadd.f32 %v298_v6, %v148_v7 }
  0xf1   :  { %v335_v9 = vpop.f32.mrf.mxu0 }
  0xf2   :  { %152 = vadd.xlane.f32.xlu0 %v536_v8  ;;  %v155_v10 = vmul.f32 %v536_v8, %v536_v8 }
  0xf6   :  { %156 = vadd.xlane.f32.xlu0 %v155_v10 }
 0x17b   :  { %v153_v27 = vpop.xlane.xlu0 %152 }
 0x17c   :  { %v154_v28 = vmul.f32 0.02, %v153_v27 }
 0x17e   :  { %v159_v30 = vmul.f32 %v154_v28, %v154_v28  ;;  %v162_v35 = vsub.f32 %v536_v8, %v154_v28 }
 0x17f   :  { %v157_v29 = vpop.xlane.xlu0 %156 }
 0x180   :  { %v158_v31 = vmul.f32 0.02, %v157_v29 }
 0x182   :  { %v160_v32 = vsub.f32 %v158_v31, %v159_v30 }
 0x184   :  { %v161_v33 = vmax.f32 %v160_v32, 0.0 }
 0x186   :  { %v163_v34 = vadd.f32 1e-05, %v161_v33 }
 0x188   :  { %379 = vrsqrt.f32 %v163_v34 }
 0x195   :  { %v380_v36 = vpop.eup %379 }
 0x196   :  { %v165_v38 = vmul.f32 %v380_v36, %v162_v35 }
 0x198   :  { %v173_v40 = vmul.f32 %v300_v37, %v165_v38 }
 0x19a   :  { %v181_v41 = vadd.f32 %v301_v39, %v173_v40 }
 0x19c   :  { %v183_v42 = vmul.f32 0.70710677, %v181_v41  ;;  %v182_v44 = vmul.f32 0.5, %v181_v41 }
 0x19e   :  { %381 = verf.f32 %v183_v42 }
 0x1ab   :  { %v382_v43 = vpop.eup %381 }
 0x1ac   :  { %v185_v45 = vadd.f32 1.0, %v382_v43 }
 0x1ae   :  { %v186_v46 = vmul.f32 %v185_v45, %v182_v44 }
 0x1b0   :  { %369 = vmatmul.mubr.f32.vlgmr.msra.gmra.mxu1 %v186_v46 }
 0x270   :  { %v276_v48 = vpop.f32.mrf.mxu1 }
 0x271   :  { %v277_v49 = vadd.f32 %v302_v47, %v276_v48 }
 0x272   :  { %v370_v50 = vpop.f32.mrf.mxu1 }
 0x273   :  { %281 = vst.msk [vmem:[#allocation8] sm:$0xff] %vm280_vm2, %v277_v49 }
 0x274   :  { %454 = shalt.err (!%p451_p5)
}
 0x275   :  { %291 = dma.vmem_to_hbm [thread:$0]  %s289_s3, 128, %s576_s7, [#allocation4]  }
 0x276   :  { %467 = dma.done.wait [#allocation4], 128  }
 0x277   :  { %468 = vsyncadd [#allocation4], 4294967168 }
 0x278   :  { %295 = vsyncpa [#allocation3], 1 }
 0x279   :  { %296 = vsyncpa [#allocation6], 1 }
 0x27a   :  { %297 = vsyncpa [#allocation4], 1 }

</bundles_post_ra>
